<compile_context>
chip_gen: v7x
topology: tpu7x:2x2x1
jax: 0.10.0
libtpu: 0.0.40
codegen_flags: <defaults>
</compile_context>

<pallas_src>
import functools

import jax
import jax.numpy as jnp
from jax.experimental import pallas as pl
from jax.experimental.pallas import tpu as pltpu

_HIDDEN = 32            # Linear(D, 32) -> Sigmoid -> Linear(32, 1)
_LANE = 128
_X_TILE_BUDGET = 4 * 1024 * 1024   # per pipeline buffer, in lane-padded bytes


def _round_up(x, m):
    return (x + m - 1) // m * m


def _pick_stream_dtype():
    """bf16 for the dominant x/param HBM streams on v6e / v7x; f32 otherwise.

    Accumulation and elementwise math stay f32 inside the kernel regardless.
    """
    try:
        kind = jax.devices()[0].device_kind.lower()
    except Exception:  # pragma: no cover - no backend available
        return jnp.float32
    if "v6" in kind or "v7" in kind:
        return jnp.bfloat16
    return jnp.float32


def _disc_kernel(stage_ref, x_ref, p_ref, b2_ref, o_ref):
    """One batch tile of  sigmoid(x @ W1 + b1) @ w2 + b2  for the selected stage.

    Per-grid-step shapes:
      x_ref : (TB, D)     VMEM (f32 or bf16)
      p_ref : (D+2, H)    VMEM, stage-selected: rows [0:D]=W1, [D]=b1, [D+1]=w2
      b2_ref: (1, 1)      SMEM scalar
      o_ref : (1, TB)     VMEM, lane-dense (batch on the lane axis)
    """
    del stage_ref  # only consumed by the index_maps (scalar prefetch)
    d = x_ref.shape[1]

    w1 = p_ref[:d, :]                                   # (D, H), static slice
    b1 = p_ref[d:d + 1, :].astype(jnp.float32)          # (1, H)
    w2 = p_ref[d + 1:d + 2, :].astype(jnp.float32)      # (1, H)

    # Layer 1 on the MXU with f32 accumulation (x/W1 may be f32 or bf16).
    h = jnp.dot(x_ref[...], w1, preferred_element_type=jnp.float32)
    h = jax.nn.sigmoid(h + b1)                           # (TB, H), EUP

    # Layer 2 (H -> 1): VPU multiply + cross-lane reduce; no second MXU trip.
    y = jnp.sum(h * w2, axis=1)                          # (TB,)
    y = y + b2_ref[0, 0].astype(jnp.float32)             # SMEM scalar add

    # Lane-dense store: batch lives on the lane axis of the (1, TB) block.
    # (Sublane->lane relayout of <= TB*4 bytes per step; negligible vs. x DMA.)
    o_ref[...] = y[None, :].astype(o_ref.dtype)


@functools.partial(jax.jit, static_argnames=("block_b", "stream_dtype"))
def discriminator_forward(next_s, packed, b2, stage_idx, *,
                          block_b=8192, stream_dtype=None):
    """next_s: (B, D).  packed: (S, D+2, H) = [W1; b1; w2] per stage.
       b2: (S, 1, 1).  stage_idx: int scalar.  Returns (B, 1) float32."""
    B, D = next_s.shape
    S, dp2, H = packed.shape
    assert dp2 == D + 2, (dp2, D)
    assert block_b > 0 and block_b % _LANE == 0, \
        "block_b must be a positive multiple of 128 (lane rule for (1, tb) out)"

    if stream_dtype is None:
        stream_dtype = _pick_stream_dtype()
    # Ideally the upstream producer already emits bf16 so this convert fuses;
    # here it is a cheap standalone convert on v6e/v7x, a no-op on v5e.
    if next_s.dtype != stream_dtype:
        next_s = next_s.astype(stream_dtype)
    if packed.dtype != stream_dtype:
        packed = packed.astype(stream_dtype)            # tiny (S, D+2, H)

    # --- Batch tile selection (no padding of x, ever) -----------------------
    # Cap tb so one lane-padded x buffer stays under the budget: VMEM footprint
    # per row is round_up(D,128)*itemsize (D<128 inflates by 128/D).
    itemsize = jnp.dtype(stream_dtype).itemsize
    padded_row_bytes = _round_up(D, _LANE) * itemsize
    tb_cap = max(_LANE, (_X_TILE_BUDGET // padded_row_bytes) // _LANE * _LANE)
    tb = min(block_b, tb_cap)

    if B <= tb:
        # Single grid step, full-array blocks: no (8,128) constraint, no waste.
        tb = B
        num_tiles = 1
    else:
        # Multi-tile: tb is a multiple of 128; last block may be partial and is
        # read-padded / write-masked by Pallas (rows independent -> safe).
        num_tiles = (B + tb - 1) // tb

    stage = jnp.asarray(stage_idx, jnp.int32).reshape(1)

    grid_spec = pltpu.PrefetchScalarGridSpec(
        num_scalar_prefetch=1,
        grid=(num_tiles,),
        in_specs=[
            # x tile, streamed over the batch (double-buffered by Pallas).
            pl.BlockSpec((tb, D), lambda i, s: (i, 0)),
            # Stage-selected packed params (leading stage dim squeezed away);
            # block index is constant across i -> fetched once, not per step.
            pl.BlockSpec((None, D + 2, H), lambda i, s: (s[0], 0, 0)),
            # b2 scalar in SMEM (no padded (8,128) VMEM tile for a (1,1)).
            pl.BlockSpec((None, 1, 1), lambda i, s: (s[0], 0, 0),
                         memory_space=pltpu.MemorySpace.SMEM),
        ],
        out_specs=pl.BlockSpec((1, tb), lambda i, s: (0, i)),
    )

    # TODO(synk): on v7x with very large B, dimension_semantics=(pltpu.CORE_PARALLEL,)
    # (or an explicit core_map split) would shard the batch across the 2 TCs;
    # kept as plain "parallel" here since it is safe on all generations.
    out = pl.pallas_call(
        _disc_kernel,
        grid_spec=grid_spec,
        out_shape=jax.ShapeDtypeStruct((1, B), jnp.float32),
        compiler_params=pltpu.CompilerParams(
            dimension_semantics=("parallel",),
            # v5e scoped default is 16 MiB; our tiling keeps each x buffer
            # <= ~4 MiB, so 32 MiB is ample headroom and is below v7x's
            # 64 MiB physical VMEM.
            vmem_limit_bytes=32 * 1024 * 1024,
        ),
        cost_estimate=pl.CostEstimate(
            flops=2 * B * D * H + 3 * B * H,
            transcendentals=B * H,
            bytes_accessed=B * D * itemsize + (D + 2) * H * itemsize
                           + 4 + 4 * B),
    )(stage, next_s, packed, b2)

    # (1, B) lane-dense slab -> (B, 1) column (same element order; free reshape).
    return out.reshape(B, 1)


class Discriminator:
    """JAX/Pallas port of the PyTorch Discriminator (forward path)."""

    def __init__(self, n_stages, state_shape, hidden=_HIDDEN, key=None):
        self.n_stages = n_stages
        self.state_shape = state_shape
        self.hidden = hidden
        if key is None:
            key = jax.random.PRNGKey(0)
        k1, k2, k3, k4 = jax.random.split(key, 4)
        s1 = 1.0 / jnp.sqrt(jnp.float32(state_shape))
        s2 = 1.0 / jnp.sqrt(jnp.float32(hidden))
        # Per-stage params (PyTorch nn.Linear default init ranges).
        self.w1 = jax.random.uniform(k1, (n_stages, state_shape, hidden),
                                     jnp.float32, -s1, s1)          # (S, D, H)
        self.b1 = jax.random.uniform(k2, (n_stages, hidden),
                                     jnp.float32, -s1, s1)          # (S, H)
        self.w2 = jax.random.uniform(k3, (n_stages, hidden),
                                     jnp.float32, -s2, s2)          # (S, H)
        self.b2 = jax.random.uniform(k4, (n_stages, 1, 1),
                                     jnp.float32, -s2, s2)          # (S, 1, 1)
        # Pack W1 | b1 | w2 row-wise -> one VMEM param stream per stage.
        self.packed = jnp.concatenate(
            [self.w1, self.b1[:, None, :], self.w2[:, None, :]], axis=1)
        self.trained = [False] * n_stages

    def set_trained(self, stage_idx):
        self.trained[stage_idx] = True

    def set_trained_all(self):
        for idx in range(self.n_stages):
            self.set_trained(idx)

    def __call__(self, next_s, stage_idx):
        # Stage selection happens inside the kernel via scalar prefetch.
        return discriminator_forward(next_s, self.packed, self.b2, stage_idx)

    # TODO(synk): get_reward's per-row stage gather / trained-flag Python logic
    # stays in plain JAX glue (no hot-path compute); forward() is the kernel.


def _reference_forward(next_s, w1, b1, w2, b2):
    h = jax.nn.sigmoid(next_s @ w1 + b1[None, :])        # (B, H)
    return h @ w2[:, None] + b2                           # (B, 1)


if __name__ == "__main__":
    key = jax.random.PRNGKey(0)
    n_stages, D = 3, 16

    disc = Discriminator(n_stages=n_stages, state_shape=D, key=key)
    kx, ky = jax.random.split(jax.random.PRNGKey(1))

    # Tolerance depends on whether the x stream was cast to bf16 (v6e/v7x).
    tol = 3e-2 if _pick_stream_dtype() == jnp.bfloat16 else 1e-4

    # Small batch: single grid step, full-array blocks.
    x_small = jax.random.normal(kx, (8, D), jnp.float32)
    out_small = jax.block_until_ready(disc(x_small, stage_idx=1))
    ref_small = _reference_forward(x_small, disc.w1[1], disc.b1[1],
                                   disc.w2[1], disc.b2[1, 0, 0])
    assert out_small.shape == (8, 1), out_small.shape
    assert jnp.allclose(out_small, ref_small, atol=tol, rtol=tol), \
        float(jnp.max(jnp.abs(out_small - ref_small)))

    # Multi-tile path with a partial last block (no padding anywhere):
    # B=300 with block_b=128 -> grid=3, last block covers only 44 rows.
    x_mid = jax.random.normal(ky, (300, D), jnp.float32)
    out_mid = jax.block_until_ready(
        discriminator_forward(x_mid, disc.packed, disc.b2, 2, block_b=128))
    ref_mid = _reference_forward(x_mid, disc.w1[2], disc.b1[2],
                                 disc.w2[2], disc.b2[2, 0, 0])
    assert out_mid.shape == (300, 1), out_mid.shape
    assert jnp.allclose(out_mid, ref_mid, atol=tol, rtol=tol), \
        float(jnp.max(jnp.abs(out_mid - ref_mid)))

    # Same batch through the default (single fat step) path.
    out_default = jax.block_until_ready(disc(x_mid, stage_idx=2))
    assert out_default.shape == (300, 1), out_default.shape
    assert jnp.allclose(out_default, ref_mid, atol=tol, rtol=tol), \
        float(jnp.max(jnp.abs(out_default - ref_mid)))

    print("KERNEL_OK")
</pallas_src>

<mosaic_0001>
module attributes {stable_mosaic.version = 11 : i64} {
  func.func @_disc_kernel(%arg0: i32, %arg1: memref<1xi32, #tpu.memory_space<smem>>, %arg2: memref<8x16xf32, #tpu.memory_space<vmem>>, %arg3: memref<1x18x32xf32, #tpu.memory_space<vmem>>, %arg4: memref<1x1x1xf32, #tpu.memory_space<smem>>, %arg5: memref<1x8xf32, #tpu.memory_space<vmem>>) attributes {dimension_semantics = [#tpu.dimension_semantics<parallel>], iteration_bounds = array<i64: 1>, scalar_prefetch = 1 : i64, scratch_operands = 0 : i64, tpu.core_type = #tpu.core_type<tc>, window_params = [{transform_indices = @transform_0, window_bounds = array<i64: 8, 16>}, {transform_indices = @transform_1, window_bounds = array<i64: 1, 18, 32>}, {transform_indices = @transform_2, window_bounds = array<i64: 1, 1, 1>}, {transform_indices = @transform_3, window_bounds = array<i64: 1, 8>}]} {
    %c0 = arith.constant 0 : index
    %c0_0 = arith.constant 0 : index
    %c0_1 = arith.constant 0 : index
    %0 = vector.load %arg3[%c0, %c0_0, %c0_1] : memref<1x18x32xf32, #tpu.memory_space<vmem>>, vector<1x16x32xf32>
    %1 = vector.shape_cast %0 : vector<1x16x32xf32> to vector<16x32xf32>
    %c0_2 = arith.constant 0 : index
    %c16 = arith.constant 16 : index
    %c0_3 = arith.constant 0 : index
    %2 = vector.load %arg3[%c0_2, %c16, %c0_3] : memref<1x18x32xf32, #tpu.memory_space<vmem>>, vector<1x1x32xf32>
    %3 = vector.shape_cast %2 : vector<1x1x32xf32> to vector<1x32xf32>
    %c0_4 = arith.constant 0 : index
    %c17 = arith.constant 17 : index
    %c0_5 = arith.constant 0 : index
    %4 = vector.load %arg3[%c0_4, %c17, %c0_5] : memref<1x18x32xf32, #tpu.memory_space<vmem>>, vector<1x1x32xf32>
    %5 = vector.shape_cast %4 : vector<1x1x32xf32> to vector<1x32xf32>
    %c0_6 = arith.constant 0 : index
    %c0_7 = arith.constant 0 : index
    %6 = vector.load %arg2[%c0_6, %c0_7] : memref<8x16xf32, #tpu.memory_space<vmem>>, vector<8x16xf32>
    %cst = arith.constant dense<0.000000e+00> : vector<8x32xf32>
    %7 = tpu.matmul %6, %1, %cst {dimension_numbers = #tpu.dot_dimension_numbers<[1], [0], [0], [1], [0, 0, 1, 1], [], []>} : vector<8x16xf32>, vector<16x32xf32>, vector<8x32xf32> -> vector<8x32xf32>
    %8 = vector.broadcast %3 : vector<1x32xf32> to vector<8x32xf32>
    %9 = arith.addf %7, %8 : vector<8x32xf32>
    %10 = arith.negf %9 : vector<8x32xf32>
    %11 = math.exp %10 : vector<8x32xf32>
    %cst_8 = arith.constant 1.000000e+00 : f32
    %12 = vector.broadcast %cst_8 : f32 to vector<8x32xf32>
    %13 = arith.addf %12, %11 : vector<8x32xf32>
    %14 = arith.divf %12, %13 : vector<8x32xf32>
    %15 = vector.broadcast %5 : vector<1x32xf32> to vector<8x32xf32>
    %16 = arith.mulf %14, %15 : vector<8x32xf32>
    %cst_9 = arith.constant dense<0.000000e+00> : vector<8xf32>
    %17 = vector.multi_reduction <add>, %16, %cst_9 [1] : vector<8x32xf32> to vector<8xf32>
    %c0_10 = arith.constant 0 : index
    %c0_11 = arith.constant 0 : index
    %c0_12 = arith.constant 0 : index
    %18 = memref.load %arg4[%c0_10, %c0_11, %c0_12] : memref<1x1x1xf32, #tpu.memory_space<smem>>
    %19 = vector.broadcast %18 : f32 to vector<8xf32>
    %20 = arith.addf %17, %19 : vector<8xf32>
    %21 = vector.shape_cast %20 : vector<8xf32> to vector<1x8xf32>
    %c0_13 = arith.constant 0 : index
    %c0_14 = arith.constant 0 : index
    %22 = vector.load %arg5[%c0_13, %c0_14] : memref<1x8xf32, #tpu.memory_space<vmem>>, vector<1x8xf32>
    tpu.vector_store %arg5[%c0_13, %c0_14], %21 {strides = array<i32>} : memref<1x8xf32, #tpu.memory_space<vmem>>, vector<1x8xf32>,
    return
  }
  func.func @transform_0(%arg0: i32, %arg1: memref<1xi32, #tpu.memory_space<smem>>) -> (i32, i32) {
    %c0_i32 = arith.constant 0 : i32
    %c0_i32_0 = arith.constant 0 : i32
    return %arg0, %c0_i32 : i32, i32
  }
  func.func @transform_1(%arg0: i32, %arg1: memref<1xi32, #tpu.memory_space<smem>>) -> (i32, i32, i32) {
    %c0 = arith.constant 0 : index
    %0 = memref.load %arg1[%c0] : memref<1xi32, #tpu.memory_space<smem>>
    %c0_i32 = arith.constant 0 : i32
    %c0_i32_0 = arith.constant 0 : i32
    %c0_i32_1 = arith.constant 0 : i32
    return %0, %c0_i32, %c0_i32_0 : i32, i32, i32
  }
  func.func @transform_2(%arg0: i32, %arg1: memref<1xi32, #tpu.memory_space<smem>>) -> (i32, i32, i32) {
    %c0 = arith.constant 0 : index
    %0 = memref.load %arg1[%c0] : memref<1xi32, #tpu.memory_space<smem>>
    %c0_i32 = arith.constant 0 : i32
    %c0_i32_0 = arith.constant 0 : i32
    %c0_i32_1 = arith.constant 0 : i32
    return %0, %c0_i32, %c0_i32_0 : i32, i32, i32
  }
  func.func @transform_3(%arg0: i32, %arg1: memref<1xi32, #tpu.memory_space<smem>>) -> (i32, i32) {
    %c0_i32 = arith.constant 0 : i32
    %c0_i32_0 = arith.constant 0 : i32
    return %c0_i32, %arg0 : i32, i32
  }
}

</mosaic_0001>

<bundles_post_ra>
// kernel: discriminator_forward.1
= control target key start
LH: loop header
LB: loop body
LE: loop exit
PB: predicated region body
PF: predicated region fallthrough
CT: control target
= control target key end

     0   :  { %10 = vsyncpa [#allocation5], 0  ;;  %s346_s0 = inlined_call_operand.<no memory space> [shape: s32[1], index: 0, kind: input, shape index: {}]   ;;  %s347_s1 = inlined_call_operand.vmem [shape: f32[8,16], index: 1, kind: input, shape index: {}]   ;;  %s348_s2 = inlined_call_operand.hbm [shape: f32[3,18,32], index: 2, kind: input, shape index: {}]   ;;  %s349_s3 = inlined_call_operand.vmem [shape: f32[3,1,1], index: 3, kind: input, shape index: {}]   ;;  %s350_s4 = inlined_call_operand.hbm [shape: f32[1,8], index: 4, kind: output, shape index: {}]  }
   0x1   :  { %11 = vsyncpa [#allocation7], 0 }
   0x2   :  { %12 = vsyncpa [#allocation6], 0  ;;  %s200_s17 = smul.u32 384, %s346_s0  ;;  %s277_s18 = smov [#allocation4]  }
   0x3   :  { %s24_s19 = sshll.u32 %s277_s18, 4  ;;  %s37_s27 = scalar_lea.vmem %s349_s3, %s346_s0  ;;  %s25_s19 = int_to_ptr.vmem [resolvable:$true] %s24_s19 }
   0x4   :  { %s23_s22 = scalar_lea.hbm %s348_s2, %s200_s17  ;;  %s215_s5 = scalar_lea.hbm %s348_s2, 1152 }
   0x5   :  { %s213_s28 = scalar_lea.hbm %s23_s22, 384  ;;  %p216_p1 = scmp.lt.u32.totalorder %s23_s22, %s348_s2 }
   0x6   :  { %p214_p0 = scmp.ne.s32.totalorder %s23_s22, %s213_s28  ;;  %p217_p2 = scmp.lt.u32.totalorder %s215_s5, %s213_s28 }
   0x7   :  { %p219_p4 = scmp.lt.u32.totalorder %s213_s28, %s23_s22 }
   0x8   :  { %p218_p3 = por %p217_p2, %p216_p1 }
   0xa   :  { %p220_p5 = por %p219_p4, %p218_p3 }
   0xc   :  { %p221_p6 = pnand %p220_p5, %p214_p0 }
   0xe   :  { %224 = shalt.err (!%p221_p6)
}
   0xf   :  { %s225_s8 = scalar_lea.vmem %s25_s19, 384  ;;  %p230_p8 = scmp.lt.s32.totalorder %s25_s19, %s25_s19 }
  0x10   :  { %p226_p7 = scmp.ne.s32.totalorder %s25_s19, %s225_s8  ;;  %p231_p9 = scmp.lt.s32.totalorder %s225_s8, %s225_s8 }
  0x12   :  { %p232_p10 = por %p231_p9, %p230_p8 }
  0x14   :  { %p233_p11 = pnand %p232_p10, %p226_p7 }
  0x16   :  { %236 = shalt.err (!%p233_p11)
}
  0x17   :  { %s278_s0 = smov 128   ;;  %s279_s9 = smov 8  }
  0x18   :  { %30 = dma.hbm_to_vmem [thread:$0]  %s23_s22, 384, %s25_s19, [#allocation5], %s278_s0, %s278_s0, %s279_s9  }
  0x19   :  { %s39_s10 = sshll.u32 %s37_s27, 4  ;;  %s239_s13 = sshll.u32 %s349_s3, 4  ;;  %s40_s10 = int_to_ptr.vmem [resolvable:$true] %s39_s10  ;;  %s240_s13 = int_to_ptr.vmem [resolvable:$false] %s239_s13 }
  0x1a   :  { %s237_s11 = scalar_lea.vmem %s40_s10, 16  ;;  %s241_s14 = scalar_lea.vmem %s240_s13, 48 }
  0x1b   :  { %p238_p12 = scmp.ne.s32.totalorder %s40_s10, %s237_s11  ;;  %p242_p13 = scmp.lt.s32.totalorder %s40_s10, %s240_s13 }
  0x1c   :  { %p243_p0 = scmp.lt.s32.totalorder %s241_s14, %s237_s11 }
  0x1e   :  { %p244_p1 = por %p243_p0, %p242_p13 }
  0x20   :  { %p245_p2 = pnand %p244_p1, %p238_p12 }
  0x22   :  { %248 = shalt.err (!%p245_p2)
}
  0x23   :  { %s280_s15 = smov [#allocation8]  }
  0x24   :  { %42 = dma.vmem_to_smem %s40_s10, 16, %s280_s15, [#allocation7]  }
  0x25   :  { %271 = dma.done.wait [#allocation5], 384  }
  0x26   :  { %272 = vsyncadd [#allocation5], 4294966912 }
  0x27   :  { %273 = dma.done.wait [#allocation7], 16  }
  0x28   :  { %274 = vsyncadd [#allocation7], 4294967280 }
  0x29   :  { %49 = sfence }
  0x2a   :  { %v52_v0 = vld [vmem:[#allocation4] sm:$0xff]  ;;  %v53_v1 = vld [vmem:[#allocation4 + $0x8] sm:$0xff]  ;;  %v281_v2 = vmov 0.0|0.0   ;;  %vm282_vm0 = vmmov 0   ;;  %v283_v4 = vmov 0.0   ;;  %vm61_vm1 = vcmask 130048  }
  0x2b   :  { %197 = vmatprep.subr.bf16.mxu0 %v281_v2  ;;  %v198_v3 = vpack.c.bf16 %v53_v1, %v52_v0  ;;  %194 = vmatprep.mubr.msk.f32.mxu0 %vm282_vm0, %v283_v4  ;;  %v56_v5 = vld [vmem:[%s347_s1] sm:$0xff]  ;;  %v183_v6 = vld [vmem:[#allocation4 + $0x10] ss:$0 sm:$0xff]  ;;  %v186_v13 = vld [vmem:[#allocation4 + $0x11] ss:$0 sm:$0xff]  ;;  %vm146_vm2 = vcmask 261120   ;;  %v154_v17 = vlaneseq }
  0x2c   :  { %s150_s17 = sld [smem:[#allocation8]]  ;;  %s284_s1 = smov [#allocation9]   ;;  %vm161_vm3 = vcmask 57344  }
  0x2d   :  { %199 = vmatpush3.bf16.msra.mxu0 %v198_v3  ;;  %v155_v18 = vand.u32 127, %v154_v17  ;;  %v157_v19 = vshrl.u32 %v154_v17, 7  ;;  %s169_s18 = sshll.u32 %s284_s1, 4  ;;  %s170_s18 = int_to_ptr.vmem [resolvable:$true] %s169_s18 }
  0x2e   :  { %s249_s19 = scalar_lea.vmem %s170_s18, 16  ;;  %s253_s20 = scalar_lea.vmem %s170_s18, 32 }
  0x2f   :  { %v158_v21 = vsub.s32 %v155_v18, %v157_v19  ;;  %p250_p3 = scmp.ne.s32.totalorder %s170_s18, %s249_s19  ;;  %p254_p4 = scmp.lt.s32.totalorder %s170_s18, %s170_s18 }
  0x30   :  { %195 = vmatmul.mubr.msk.f32.vlgmr.msra.gmra.mrb[0].mxu0 %vm61_vm1, %v56_v5  ;;  %p255_p5 = scmp.lt.s32.totalorder %s253_s20, %s249_s19 }
  0x32   :  { %v151_v20 = vstv %s150_s17  ;;  %p256_p6 = por %p255_p5, %p254_p4 }
  0x34   :  { %p257_p7 = pnand %p256_p6, %p250_p3 }
 0x103   :  { %v131_v7 = vpop.f32.mrb[0].mxu0 }
 0x104   :  { %v132_v8 = vadd.f32 %v183_v6, %v131_v7  ;;  %v196_v9 = vpop.f32.mrb[1].mxu0 }
 0x106   :  { %v185_v10 = vmul.f32 -1.442695, %v132_v8 }
 0x108   :  { %209 = vpow2.f32 %v185_v10 }
 0x112   :  { %v210_v11 = vpop.eup %209 }
 0x113   :  { %v138_v12 = vadd.f32 1.0, %v210_v11 }
 0x115   :  { %211 = vrcp.f32 %v138_v12 }
 0x11f   :  { %v212_v14 = vpop.eup %211 }
 0x120   :  { %v145_v15 = vmul.f32 %v212_v14, %v186_v13 }
 0x122   :  { %v147_v16 = vsel %vm146_vm2, %v145_v15, 0.0 }
 0x123   :  { %148 = vadd.xlane.f32.xlu0 %v147_v16 }
 0x1b0   :  { %v149_v22 = vpop.xlane.xlu0 %148 }
 0x1b1   :  { %v152_v23 = vadd.f32 %v151_v20, %v149_v22 }
 0x1b3   :  { %v159_v24 = vrot.slane %v152_v23, %v158_v21 }
 0x1b5   :  { %162 = vst.msk [vmem:[#allocation9] sm:$0x1] %vm161_vm3, %v159_v24 }
 0x1b6   :  { %260 = shalt.err (!%p257_p7)
}
 0x1b7   :  { %s261_s23 = scalar_lea.hbm %s350_s4, 16 }
 0x1b8   :  { %p262_p8 = scmp.ne.s32.totalorder %s350_s4, %s261_s23  ;;  %p265_p9 = scmp.lt.u32.totalorder %s261_s23, %s350_s4 }
 0x1ba   :  { %p267_p10 = pnand %p265_p9, %p262_p8 }
 0x1bc   :  { %270 = shalt.err (!%p267_p10)
}
 0x1bd   :  { %172 = dma.vmem_to_hbm [thread:$0]  %s170_s18, 16, %s350_s4, [#allocation6]  }
 0x1be   :  { %275 = dma.done.wait [#allocation6], 16  }
 0x1bf   :  { %276 = vsyncadd [#allocation6], 4294967280 }
 0x1c0   :  { %176 = vsyncpa [#allocation5], 1 }
 0x1c1   :  { %177 = vsyncpa [#allocation6], 1 }
 0x1c2   :  { %178 = vsyncpa [#allocation7], 1 }

</bundles_post_ra>
